<compile_context>
chip_gen: v7x
topology: tpu7x:2x2x1
jax: 0.10.0
libtpu: 0.0.40
codegen_flags: <defaults>
</compile_context>

<pallas_src>
import functools

import numpy as np
import jax
import jax.numpy as jnp
from jax.experimental import pallas as pl
from jax.experimental.pallas import tpu as pltpu


# ----------------------------------------------------------------------------
# Pallas kernel: per sample-tile, all-neuron responses.
#   out[n, m] = exp( (rf_sin @ sin(zt))[n,m] + (rf_cos @ cos(zt))[n,m] + bias )
# rf operands are pre-scaled by 2/tuning_width and pre-masked by the one-hot
# ensemble weights in the wrapper; bias = -2*latent_dim/tuning_width.
# ----------------------------------------------------------------------------
def stochastic_neurons_kernel(zt_ref, rfs_ref, rfc_ref, out_ref, *, bias):
    zt = zt_ref[...]                                              # (D, TM)
    # Two tiny-K MXU contractions; sin/cos/exp run on the EUP slot (free-ish).
    cross = jnp.dot(rfs_ref[...], jnp.sin(zt),
                    preferred_element_type=jnp.float32)           # (NE, TM)
    cross = cross + jnp.dot(rfc_ref[...], jnp.cos(zt),
                            preferred_element_type=jnp.float32)
    out_ref[...] = jnp.exp(cross + bias).astype(out_ref.dtype)


# ----------------------------------------------------------------------------
# Chip introspection (defensive: never fails, falls back to conservative
# defaults usable on any generation).
# ----------------------------------------------------------------------------
def _chip_info():
    vmem_cap = 64 << 20          # conservative default (v7x per-TC VMEM)
    multi_core = False
    try:
        info = pltpu.get_tpu_info()
        vmem_cap = int(getattr(info, "vmem_capacity_bytes", vmem_cap))
    except Exception:
        pass
    try:
        kind = jax.devices()[0].device_kind.lower()
        # Parts that shard a "parallel" grid axis across >1 TensorCore.
        multi_core = ("v4" in kind) or ("v5p" in kind) or ("v7" in kind)
    except Exception:
        pass
    return vmem_cap, multi_core


def _select_tile_m(M, NE, D, vmem_cap, out_elt, multi_core, max_tile):
    ne_pad = ((NE + 7) // 8) * 8
    d_pad = max(8, ((D + 7) // 8) * 8)
    # Double-buffered per-sample pipeline footprint: z-in block + out block.
    per_sample = 2 * (d_pad * 4 + ne_pad * out_elt)
    # Pipeline-buffer budget: ~1/3 of physical VMEM, capped at 28 MiB.
    budget = max(8 << 20, min(28 << 20, vmem_cap // 3))
    t = budget // per_sample
    m_up = ((M + 127) // 128) * 128
    t = min(int(t), int(max_tile), m_up)
    if multi_core and m_up >= 256:
        # >=2 tiles so both TensorCores get work on megacore / v7x parts.
        t = min(t, ((m_up // 2 + 127) // 128) * 128)
    t = max(128, (t // 128) * 128)
    return t


# ----------------------------------------------------------------------------
# Wrapper: parameter preprocessing (pure glue) + pallas_call.
# ----------------------------------------------------------------------------
def stochastic_neurons_forward(z, receptive_fields, ensemble_weights,
                               *, N, num_ensemble, latent_dim,
                               tuning_width=10.0, scale=16.0,
                               max_tile_m=16384, out_dtype=jnp.float32):
    del scale  # *scale then /scale cancels exactly in the noise=False path.
    E, L = num_ensemble, latent_dim
    NE = E * N
    D = E * L
    M = z.shape[0]
    assert z.shape == (M, D)

    vmem_cap, multi_core = _chip_info()
    out_elt = jnp.dtype(out_dtype).itemsize
    tile_m = _select_tile_m(M, NE, D, vmem_cap, out_elt, multi_core, max_tile_m)
    grid_m = pl.cdiv(M, tile_m)

    inv_tw2 = 2.0 / float(tuning_width)
    bias = -float(L) * inv_tw2

    # ---- parameter preprocessing (input-independent, tiny) ----------------
    # One-hot selector + 2/tw scale folded into the stationary rf operands:
    #   rf_sin[n, e*L+k] = (2/tw) * W[n,e] * sin(rf[n,k])     (analog for cos)
    # NOTE: this collapse is exact only because ensemble_weights is one-hot
    # {0,1} (as constructed by the module, requires_grad=False).
    w_exp = jnp.repeat(ensemble_weights, L, axis=1).astype(jnp.float32)    # (NE, D)
    sin_rf = jnp.sin(receptive_fields).astype(jnp.float32)                 # (NE, L)
    cos_rf = jnp.cos(receptive_fields).astype(jnp.float32)
    rf_sin = inv_tw2 * w_exp * jnp.tile(sin_rf, (1, E))                    # (NE, D)
    rf_cos = inv_tw2 * w_exp * jnp.tile(cos_rf, (1, E))                    # (NE, D)

    # Feature-major z so the sample axis lands on lanes inside the kernel.
    zt = z.T.astype(jnp.float32)                                           # (D, M)

    kernel = functools.partial(stochastic_neurons_kernel, bias=bias)

    # ---- VMEM accounting (padded layouts) + limit --------------------------
    ne_pad = ((NE + 7) // 8) * 8
    d_pad = max(8, ((D + 7) // 8) * 8)
    d_lane = ((D + 127) // 128) * 128
    need = (2 * d_pad * tile_m * 4              # double-buffered z blocks
            + 2 * ne_pad * tile_m * out_elt     # double-buffered out blocks
            + 4 * ne_pad * d_lane * 4)          # rf_sin/rf_cos (2 bufs each)
    vmem_limit = need * 3 // 2 + (2 << 20)
    vmem_limit = max(vmem_limit, 16 << 20)
    vmem_limit = int(min(vmem_limit, max(vmem_cap - (4 << 20), need + (1 << 20))))

    cost = pl.CostEstimate(
        flops=4 * NE * D * M,
        transcendentals=NE * M + 2 * D * M,
        bytes_accessed=D * M * 4 + NE * M * out_elt + 2 * NE * D * 4)

    out = pl.pallas_call(
        kernel,
        out_shape=jax.ShapeDtypeStruct((NE, M), out_dtype),
        grid_spec=pl.GridSpec(
            grid=(grid_m,),
            in_specs=[
                pl.BlockSpec((D, tile_m), lambda i: (0, i)),   # z (feature-major)
                pl.BlockSpec((NE, D), lambda i: (0, 0)),       # rf_sin (stationary)
                pl.BlockSpec((NE, D), lambda i: (0, 0)),       # rf_cos (stationary)
            ],
            out_specs=pl.BlockSpec((NE, tile_m), lambda i: (0, i)),
        ),
        compiler_params=pltpu.CompilerParams(
            dimension_semantics=("parallel",),
            vmem_limit_bytes=vmem_limit),
        cost_estimate=cost,
    )(zt, rf_sin, rf_cos)

    # TODO(synk): noise=True (Poisson sampling) path not implemented (module default noise=False).
    return out


# ----------------------------------------------------------------------------
# Pure-JAX reference that mirrors the PyTorch forward op-for-op (for checking).
# ----------------------------------------------------------------------------
def reference_forward(z, receptive_fields, ensemble_weights, selector_eye,
                      *, latent_dim, num_ensemble, tuning_width, scale):
    def angle2vector_flat(a):
        v = jnp.stack([jnp.sin(a), jnp.cos(a)], axis=-1)
        return v.reshape(v.shape[0], -1)

    z_vector = angle2vector_flat(z)                      # (M, 2*E*L)
    rf_vector = angle2vector_flat(receptive_fields)      # (NE, 2L)

    sel = ensemble_weights[:, :, None, None] * selector_eye[None]      # (NE, E, 2L, 2L)
    sel = jnp.concatenate(jnp.split(sel, num_ensemble, axis=1), axis=3)
    sel = sel.reshape(-1, 2 * latent_dim, num_ensemble * 2 * latent_dim)

    selected = jnp.einsum('nij,mj->nim', sel, z_vector)  # matmul(selector, z_vector.T)
    dist = (rf_vector[..., None] - selected) ** 2        # (NE, 2L, M)

    def sum_pairs(x):
        return x[:, 0::2] + x[:, 1::2]

    pairs = sum_pairs(dist)
    if latent_dim == 2:
        pairs = sum_pairs(pairs)
    response = jnp.exp(-pairs / tuning_width) * scale
    responses = response[:, 0]
    return responses / scale


if __name__ == "__main__":
    # Small, module-consistent shapes.
    N = 32
    num_ensemble = 2
    latent_dim = 2
    tuning_width = 10.0
    scale = 16.0
    num_samples = 256

    NE = num_ensemble * N
    D = num_ensemble * latent_dim

    key = jax.random.PRNGKey(0)
    k_rf, k_z = jax.random.split(key)

    # Deterministic parameter init (shapes from __init__).
    receptive_fields = (jax.random.uniform(k_rf, (NE, latent_dim), dtype=jnp.float32)
                        * 2.0 * np.pi)
    ensemble_weights = jnp.repeat(jnp.eye(num_ensemble, dtype=jnp.float32), N, axis=0)  # (NE, E)
    selector_eye = jnp.stack([jnp.eye(2 * latent_dim, dtype=jnp.float32)
                              for _ in range(num_ensemble)], axis=0)                    # (E, 2L, 2L)

    # Input latent angles z: (num_samples, num_ensemble*latent_dim)
    z = jax.random.uniform(k_z, (num_samples, D), dtype=jnp.float32) * 2.0 * np.pi

    out = stochastic_neurons_forward(
        z, receptive_fields, ensemble_weights,
        N=N, num_ensemble=num_ensemble, latent_dim=latent_dim,
        tuning_width=tuning_width, scale=scale)
    out = jax.block_until_ready(out)

    ref = reference_forward(
        z, receptive_fields, ensemble_weights, selector_eye,
        latent_dim=latent_dim, num_ensemble=num_ensemble,
        tuning_width=tuning_width, scale=scale)
    ref = jax.block_until_ready(ref)

    assert out.shape == (NE, num_samples), out.shape
    assert out.dtype == jnp.float32
    np.testing.assert_allclose(np.asarray(out), np.asarray(ref), rtol=1e-5, atol=1e-5)

    print("KERNEL_OK")
</pallas_src>

<mosaic_0001>
module attributes {stable_mosaic.version = 11 : i64} {
  func.func @stochastic_neurons_kernel(%arg0: i32, %arg1: memref<4x256xf32, #tpu.memory_space<vmem>>, %arg2: memref<64x4xf32, #tpu.memory_space<vmem>>, %arg3: memref<64x4xf32, #tpu.memory_space<vmem>>, %arg4: memref<64x256xf32, #tpu.memory_space<vmem>>) attributes {dimension_semantics = [#tpu.dimension_semantics<parallel>], iteration_bounds = array<i64: 1>, scalar_prefetch = 0 : i64, scratch_operands = 0 : i64, tpu.core_type = #tpu.core_type<tc>, window_params = [{transform_indices = @transform_0, window_bounds = array<i64: 4, 256>}, {pipeline_mode = #tpu.pipeline_mode<synchronous>, transform_indices = @transform_1, window_bounds = array<i64: 64, 4>}, {pipeline_mode = #tpu.pipeline_mode<synchronous>, transform_indices = @transform_2, window_bounds = array<i64: 64, 4>}, {transform_indices = @transform_3, window_bounds = array<i64: 64, 256>}]} {
    %c0 = arith.constant 0 : index
    %c0_0 = arith.constant 0 : index
    %0 = vector.load %arg1[%c0, %c0_0] : memref<4x256xf32, #tpu.memory_space<vmem>>, vector<4x256xf32>
    %c0_1 = arith.constant 0 : index
    %c0_2 = arith.constant 0 : index
    %1 = vector.load %arg2[%c0_1, %c0_2] : memref<64x4xf32, #tpu.memory_space<vmem>>, vector<64x4xf32>
    %2 = math.sin %0 : vector<4x256xf32>
    %cst = arith.constant dense<0.000000e+00> : vector<64x256xf32>
    %3 = tpu.matmul %1, %2, %cst {dimension_numbers = #tpu.dot_dimension_numbers<[1], [0], [0], [1], [0, 0, 1, 1], [], []>} : vector<64x4xf32>, vector<4x256xf32>, vector<64x256xf32> -> vector<64x256xf32>
    %c0_3 = arith.constant 0 : index
    %c0_4 = arith.constant 0 : index
    %4 = vector.load %arg3[%c0_3, %c0_4] : memref<64x4xf32, #tpu.memory_space<vmem>>, vector<64x4xf32>
    %5 = math.cos %0 : vector<4x256xf32>
    %cst_5 = arith.constant dense<0.000000e+00> : vector<64x256xf32>
    %6 = tpu.matmul %4, %5, %cst_5 {dimension_numbers = #tpu.dot_dimension_numbers<[1], [0], [0], [1], [0, 0, 1, 1], [], []>} : vector<64x4xf32>, vector<4x256xf32>, vector<64x256xf32> -> vector<64x256xf32>
    %7 = arith.addf %3, %6 : vector<64x256xf32>
    %cst_6 = arith.constant -4.000000e-01 : f32
    %8 = vector.broadcast %cst_6 : f32 to vector<64x256xf32>
    %9 = arith.addf %7, %8 : vector<64x256xf32>
    %10 = math.exp %9 : vector<64x256xf32>
    %c0_7 = arith.constant 0 : index
    %c0_8 = arith.constant 0 : index
    %11 = vector.load %arg4[%c0_7, %c0_8] : memref<64x256xf32, #tpu.memory_space<vmem>>, vector<64x256xf32>
    tpu.vector_store %arg4[%c0_7, %c0_8], %10 {strides = array<i32>} : memref<64x256xf32, #tpu.memory_space<vmem>>, vector<64x256xf32>,
    return
  }
  func.func @transform_0(%arg0: i32) -> (i32, i32) {
    %c0_i32 = arith.constant 0 : i32
    %c0_i32_0 = arith.constant 0 : i32
    return %c0_i32, %arg0 : i32, i32
  }
  func.func @transform_1(%arg0: i32) -> (i32, i32) {
    %c0_i32 = arith.constant 0 : i32
    %c0_i32_0 = arith.constant 0 : i32
    %c0_i32_1 = arith.constant 0 : i32
    return %c0_i32, %c0_i32_0 : i32, i32
  }
  func.func @transform_2(%arg0: i32) -> (i32, i32) {
    %c0_i32 = arith.constant 0 : i32
    %c0_i32_0 = arith.constant 0 : i32
    %c0_i32_1 = arith.constant 0 : i32
    return %c0_i32, %c0_i32_0 : i32, i32
  }
  func.func @transform_3(%arg0: i32) -> (i32, i32) {
    %c0_i32 = arith.constant 0 : i32
    %c0_i32_0 = arith.constant 0 : i32
    return %c0_i32, %arg0 : i32, i32
  }
}

</mosaic_0001>

<bundles_post_ra>
// kernel: tpu_custom_call.1
= control target key start
LH: loop header
LB: loop body
LE: loop exit
PB: predicated region body
PF: predicated region fallthrough
CT: control target
= control target key end

     0   :  { %v725_v4 = vmov 0.0   ;;  %s871_s0 = inlined_call_operand.vmem [shape: f32[4,256], index: 0, kind: input, shape index: {}]   ;;  %s872_s1 = inlined_call_operand.vmem [shape: f32[64,4], index: 1, kind: input, shape index: {}]   ;;  %s873_s2 = inlined_call_operand.vmem [shape: f32[64,4], index: 2, kind: input, shape index: {}]   ;;  %s874_s3 = inlined_call_operand.hbm [shape: f32[64,256], index: 3, kind: output, shape index: {}]  }
   0x1   :  { %v758_v0 = vld [vmem:[%s871_s0] sm:$0xff]  ;;  %335 = vmatprep.mubr.f32.mxu1 %v725_v4  ;;  %478 = vmatprep.mubr.f32.mxu0 %v725_v4 }
   0x2   :  { %v27_v1 = vand.u32 2139095040, %v758_v0  ;;  %v24_v3 = vand.u32 2147483647, %v758_v0 }
   0x4   :  { %v28_v2 = vshrl.u32 %v27_v1, 23  ;;  %v31_v7 = vand.u32 8388607, %v24_v3 }
   0x6   :  { %v607_v5 = vadd.s32 4294967169, %v28_v2 }
   0x8   :  { %v34_v6 = vadd.s32 1, %v607_v5 }
   0xa   :  { %vm35_vm0 = vcmp.gt.s32.totalorder %v34_v6, 0 }
   0xb   :  { %8 = vsyncpa [#allocation3], 0  ;;  %v36_v8 = vsel %vm35_vm0, %v34_v6, 0  ;;  %v32_v10 = vor.u32 8388608, %v31_v7  ;;  %v726_v13 = vmov 683565275   ;;  %vm116_vm15 = vweird.f32 %v758_v0 }
   0xc   :  { %v38_v9 = vand.u32 31, %v36_v8  ;;  %v37_v11 = vshrl.u32 %v36_v8, 5  ;;  %v727_v15 = vmov 2475754826   ;;  %v728_v17 = vmov 2131351028  }
   0xd   :  { %v729_v19 = vmov 2102212464   ;;  %v730_v21 = vmov 920167782   ;;  %v731_v28 = vmov 1326507024  }
   0xe   :  { %v39_v12 = vsub.s32 32, %v38_v9  ;;  %v41_v14 = vshll.u32 %v726_v13, %v38_v9  ;;  %v44_v16 = vshll.u32 %v727_v15, %v38_v9  ;;  %v47_v18 = vshll.u32 %v728_v17, %v38_v9 }
   0xf   :  { %v50_v20 = vshll.u32 %v729_v19, %v38_v9  ;;  %v53_v22 = vshll.u32 %v730_v21, %v38_v9  ;;  %vm56_vm1 = vcmp.lt.s32.totalorder %v37_v11, 1  ;;  %v72_v30 = vshll.u32 %v32_v10, 8 }
  0x10   :  { %v40_v23 = vshrl.u32 %v726_v13, %v39_v12  ;;  %v42_v24 = vshrl.u32 %v727_v15, %v39_v12  ;;  %v45_v25 = vshrl.u32 %v728_v17, %v39_v12  ;;  %v48_v26 = vshrl.u32 %v729_v19, %v39_v12 }
  0x11   :  { %v51_v27 = vshrl.u32 %v730_v21, %v39_v12  ;;  %v54_v29 = vshrl.u32 %v731_v28, %v39_v12  ;;  %vm59_vm2 = vcmp.lt.s32.totalorder %v37_v11, 4  ;;  %vm57_vm3 = vcmp.lt.s32.totalorder %v37_v11, 2 }
  0x12   :  { %v43_v31 = vor.u32 %v42_v24, %v41_v14  ;;  %v46_v32 = vor.u32 %v45_v25, %v44_v16  ;;  %v49_v33 = vor.u32 %v48_v26, %v47_v18  ;;  %vm58_vm4 = vcmp.lt.s32.totalorder %v37_v11, 3 }
  0x13   :  { %v52_v34 = vor.u32 %v51_v27, %v50_v20  ;;  %v55_v35 = vor.u32 %v54_v29, %v53_v22  ;;  %vm26_vm7 = vcmp.lt.s32.totalorder %v758_v0, 0  ;;  %vm25_vm8 = vcmp.le.f32.partialorder %v24_v3, 0.7853982 }
  0x14   :  { %v60_v36 = vsel %vm56_vm1, %v40_v23, %v43_v31  ;;  %v61_v37 = vsel %vm59_vm2, %v49_v33, 2102212464  ;;  %v64_v38 = vsel %vm56_vm1, %v43_v31, %v46_v32  ;;  %v68_v39 = vsel %vm56_vm1, %v46_v32, %v49_v33 }
  0x15   :  { %v62_v40 = vsel %vm58_vm4, %v46_v32, %v61_v37  ;;  %v65_v41 = vsel %vm59_vm2, %v52_v34, 920167782  ;;  %v69_v42 = vsel %vm59_vm2, %v55_v35, 1326507024  ;;  %vm266_vm0 = vcmask 1043456  }
  0x16   :  { %v66_v43 = vsel %vm58_vm4, %v49_v33, %v65_v41  ;;  %v70_v44 = vsel %vm58_vm4, %v52_v34, %v69_v42  ;;  %v63_v45 = vsel %vm57_vm3, %v60_v36, %v62_v40  ;;  %vm241_vm1 = vcmask 31744   ;;  %v17_v40 = vld [vmem:[%s872_s1 + $0x8] sm:$0xff]  ;;  %v130_v41 = vld [vmem:[%s873_s2 + $0x10] sm:$0xff] }
  0x17   :  { %v67_v46 = vsel %vm57_vm3, %v64_v38, %v66_v43  ;;  %v71_v47 = vsel %vm57_vm3, %v68_v39, %v70_v44  ;;  %v79_v52 = vmul.u32 %v72_v30, %v63_v45  ;;  %v128_v38 = vld [vmem:[%s873_s2] sm:$0xff]  ;;  %v129_v39 = vld [vmem:[%s873_s2 + $0x8] sm:$0xff]  ;;  %v18_v42 = vld [vmem:[%s872_s1 + $0x10] sm:$0xff] }
  0x18   :  { %v766_v48 = vmul.u32.u64.low %v72_v30, %v71_v47  ;;  %v767_v49 = vmul.u32.u64.high %v72_v30, %v71_v47, %v766_v48  ;;  %v769_v50 = vmul.u32.u64.low %v72_v30, %v67_v46  ;;  %v770_v51 = vmul.u32.u64.high %v72_v30, %v67_v46, %v769_v50  ;;  %v131_v43 = vld [vmem:[%s873_s2 + $0x18] sm:$0xff]  ;;  %v132_v45 = vld [vmem:[%s873_s2 + $0x20] sm:$0xff]  ;;  %v133_v47 = vld [vmem:[%s873_s2 + $0x28] sm:$0xff] }
  0x19   :  { %v19_v44 = vld [vmem:[%s872_s1 + $0x18] sm:$0xff]  ;;  %v20_v46 = vld [vmem:[%s872_s1 + $0x20] sm:$0xff]  ;;  %v21_v48 = vld [vmem:[%s872_s1 + $0x28] sm:$0xff] }
  0x1a   :  { %vm81_vm5 = vc.u32 %v767_v49, %v769_v50  ;;  %v82_v53 = vadd.s32 1, %v770_v51  ;;  %v80_v1 = vadd.s32 %v769_v50, %v767_v49  ;;  %v134_v49 = vld [vmem:[%s873_s2 + $0x30] sm:$0xff] }
  0x1b   :  { %v22_v50 = vld [vmem:[%s872_s1 + $0x30] sm:$0xff] }
  0x1c   :  { %v83_v54 = vsel %vm81_vm5, %v82_v53, %v770_v51  ;;  %v135_v51 = vld [vmem:[%s873_s2 + $0x38] sm:$0xff] }
  0x1d   :  { %v84_v55 = vadd.s32 %v83_v54, %v79_v52  ;;  %v23_v52 = vld [vmem:[%s872_s1 + $0x38] sm:$0xff] }
  0x1f   :  { %v85_v56 = vadd.s32 536870912, %v84_v55 }
  0x21   :  { %v86_v57 = vshrl.u32 %v85_v56, 30 }
  0x23   :  { %v87_v58 = vshll.u32 %v86_v57, 30  ;;  %v110_v15 = vsub.s32 4, %v86_v57 }
  0x25   :  { %v88_v59 = vsub.s32 %v84_v55, %v87_v58  ;;  %v111_v18 = vsel %vm26_vm7, %v110_v15, %v86_v57 }
  0x26   :  { %v113_v21 = vsel %vm25_vm8, 0, %v111_v18 }
  0x27   :  { %v90_v60 = vsub.s32 0, %v88_v59  ;;  %v117_v22 = vadd.s32 3, %v113_v21  ;;  %v229_v23 = vand.u32 3, %v113_v21 }
  0x29   :  { %v608_v61 = vmin.u32 %v90_v60, %v88_v59  ;;  %v118_v24 = vand.u32 3, %v117_v22  ;;  %vm234_vm9 = vcmp.eq.s32.totalorder %v229_v23, 2  ;;  %vm231_vm11 = vcmp.eq.s32.totalorder %v229_v23, 0 }
  0x2a   :  { %vm230_vm13 = vcmp.lt.s32.totalorder %v229_v23, 2 }
  0x2b   :  { %v92_v62 = vclz %v608_v61  ;;  %vm123_vm10 = vcmp.eq.s32.totalorder %v118_v24, 2  ;;  %vm120_vm12 = vcmp.eq.s32.totalorder %v118_v24, 0  ;;  %vm119_vm14 = vcmp.lt.s32.totalorder %v118_v24, 2 }
  0x2d   :  { %v609_v63 = vadd.s32 4294967294, %v92_v62 }
  0x2f   :  { %vm610_vm6 = vcmp.lt.s32.totalorder %v609_v63, 0 }
  0x30   :  { %v95_v2 = vsel %vm610_vm6, 0, %v609_v63 }
  0x31   :  { %v96_v5 = vsub.s32 32, %v95_v2  ;;  %v97_v6 = vshll.u32 %v88_v59, %v95_v2  ;;  %v100_v7 = vsub.s32 4294967266, %v95_v2 }
  0x33   :  { %v98_v8 = vshrl.u32 %v80_v1, %v96_v5  ;;  %v101_v9 = vadd.s32 127, %v100_v7 }
  0x35   :  { %v99_v10 = vor.u32 %v98_v8, %v97_v6  ;;  %v102_v11 = vshll.u32 %v101_v9, 23 }
  0x37   :  { %v103_v12 = vor.u32 4788187, %v102_v11  ;;  %v106_v13 = vcvt.s32.f32 %v99_v10 }
  0x39   :  { %v104_v14 = vand.u32 2147483647, %v103_v12 }
  0x3b   :  { %v107_v16 = vmul.f32 %v106_v13, %v104_v14 }
  0x3d   :  { %v108_v17 = vxor.u32 2147483648, %v107_v16 }
  0x3f   :  { %v109_v19 = vsel %vm26_vm7, %v108_v17, %v107_v16 }
  0x40   :  { %v112_v20 = vsel %vm25_vm8, %v758_v0, %v109_v19  ;;  %v16_v0 = vld [vmem:[%s872_s1] sm:$0xff]  ;;  %s732_s1 = smov [#allocation2]  }
  0x41   :  { %665 = vcosq.f32 %v112_v20  ;;  %s596_s2 = sshll.u32 %s732_s1, 4  ;;  %s597_s2 = int_to_ptr.vmem [resolvable:$true] %s596_s2 }
  0x42   :  { %667 = vsinq.f32 %v112_v20  ;;  %s701_s17 = scalar_lea.vmem %s597_s2, 2048  ;;  %p706_p1 = scmp.lt.s32.totalorder %s597_s2, %s597_s2 }
  0x43   :  { %p702_p0 = scmp.ne.s32.totalorder %s597_s2, %s701_s17  ;;  %p707_p2 = scmp.lt.s32.totalorder %s701_s17, %s701_s17 }
  0x45   :  { %p708_p3 = por %p707_p2, %p706_p1 }
  0x47   :  { %p709_p4 = pnand %p708_p3, %p702_p0 }
  0x4b   :  { %v666_v25 = vpop.eup %665 }
  0x4c   :  { %v668_v26 = vpop.eup %667  ;;  %v124_v27 = vxor.u32 2147483648, %v666_v25 }
  0x4d   :  { %v121_v28 = vxor.u32 2147483648, %v668_v26 }
  0x4e   :  { %v236_v3 = vsel %vm234_vm9, %v124_v27, %v668_v26  ;;  %v125_v29 = vsel %vm123_vm10, %v124_v27, %v668_v26 }
  0x4f   :  { %v233_v30 = vsel %vm231_vm11, %v666_v25, %v121_v28  ;;  %v122_v31 = vsel %vm120_vm12, %v666_v25, %v121_v28 }
  0x50   :  { %v237_v32 = vsel %vm230_vm13, %v233_v30, %v236_v3  ;;  %v126_v33 = vsel %vm119_vm14, %v122_v31, %v125_v29 }
  0x51   :  { %v238_v34 = vsel %vm116_vm15, nan, %v237_v32  ;;  %v127_v35 = vsel %vm116_vm15, nan, %v126_v33 }
  0x52   :  { %v240_v36 = vcombine.high %v238_v34, %v238_v34  ;;  %v385_v37 = vcombine.high %v127_v35, %v127_v35 }
  0x54   :  { %615 = vmatprep.subr.msk.mxu1 %vm266_vm0, %v240_v36  ;;  %625 = vmatprep.subr.msk.mxu0 %vm266_vm0, %v385_v37 }
  0x55   :  { %616 = vmatpush1.msk.msra.mxu1 %vm266_vm0, %v238_v34  ;;  %626 = vmatpush1.msk.msra.mxu0 %vm266_vm0, %v127_v35 }
  0x56   :  { %617 = vmatmul.mubr.msk.f32.vlgmr.msra.gmra.mrb[0].mxu1 %vm241_vm1, %v128_v38  ;;  %627 = vmatmul.mubr.msk.f32.vlgmr.msra.gmra.mrb[0].mxu0 %vm241_vm1, %v16_v0 }
  0x57   :  { %341 = vmatprep.mubr.f32.mxu1 %v725_v4  ;;  %484 = vmatprep.mubr.f32.mxu0 %v725_v4 }
  0x5a   :  { %618 = vmatmul.mubr.msk.f32.gmra.mrb[2].mxu1 %vm241_vm1, %v129_v39  ;;  %628 = vmatmul.mubr.msk.f32.gmra.mrb[2].mxu0 %vm241_vm1, %v17_v40 }
  0x5b   :  { %347 = vmatprep.mubr.f32.mxu1 %v725_v4  ;;  %490 = vmatprep.mubr.f32.mxu0 %v725_v4 }
  0x5e   :  { %619 = vmatmul.mubr.msk.f32.gmra.mrb[4].mxu1 %vm241_vm1, %v130_v41  ;;  %629 = vmatmul.mubr.msk.f32.gmra.mrb[4].mxu0 %vm241_vm1, %v18_v42 }
  0x5f   :  { %353 = vmatprep.mubr.f32.mxu1 %v725_v4  ;;  %496 = vmatprep.mubr.f32.mxu0 %v725_v4 }
  0x62   :  { %620 = vmatmul.mubr.msk.f32.gmra.mrb[6].mxu1 %vm241_vm1, %v131_v43  ;;  %630 = vmatmul.mubr.msk.f32.gmra.mrb[6].mxu0 %vm241_vm1, %v19_v44 }
  0x63   :  { %359 = vmatprep.mubr.f32.mxu1 %v725_v4  ;;  %502 = vmatprep.mubr.f32.mxu0 %v725_v4 }
  0x66   :  { %621 = vmatmul.mubr.msk.f32.gmra.mrb[8].mxu1 %vm241_vm1, %v132_v45  ;;  %631 = vmatmul.mubr.msk.f32.gmra.mrb[8].mxu0 %vm241_vm1, %v20_v46 }
  0x67   :  { %365 = vmatprep.mubr.f32.mxu1 %v725_v4  ;;  %508 = vmatprep.mubr.f32.mxu0 %v725_v4 }
  0x6a   :  { %622 = vmatmul.mubr.msk.f32.gmra.mrb[10].mxu1 %vm241_vm1, %v133_v47  ;;  %632 = vmatmul.mubr.msk.f32.gmra.mrb[10].mxu0 %vm241_vm1, %v21_v48 }
  0x6b   :  { %371 = vmatprep.mubr.f32.mxu1 %v725_v4  ;;  %514 = vmatprep.mubr.f32.mxu0 %v725_v4 }
  0x6e   :  { %623 = vmatmul.mubr.msk.f32.gmra.mrb[12].mxu1 %vm241_vm1, %v134_v49  ;;  %633 = vmatmul.mubr.msk.f32.gmra.mrb[12].mxu0 %vm241_vm1, %v22_v50 }
  0x6f   :  { %377 = vmatprep.mubr.f32.mxu1 %v725_v4  ;;  %520 = vmatprep.mubr.f32.mxu0 %v725_v4 }
  0x72   :  { %624 = vmatmul.mubr.msk.f32.gmra.mrb[14].mxu1 %vm241_vm1, %v135_v51  ;;  %634 = vmatmul.mubr.msk.f32.gmra.mrb[14].mxu0 %vm241_vm1, %v23_v52 }
 0x129   :  { %v337_v53 = vpop.f32.mrb[0].mxu1  ;;  %v480_v54 = vpop.f32.mrb[0].mxu0 }
 0x12a   :  { %v481_v55 = vadd.f32 %v480_v54, %v337_v53  ;;  %v339_v56 = vpop.f32.mrb[1].mxu1  ;;  %v482_v57 = vpop.f32.mrb[1].mxu0 }
 0x12b   :  { %v483_v58 = vadd.f32 %v482_v57, %v339_v56 }
 0x12c   :  { %v527_v59 = vadd.f32 -0.4, %v481_v55 }
 0x12d   :  { %v528_v4 = vadd.f32 -0.4, %v483_v58  ;;  %v343_v60 = vpop.f32.mrb[2].mxu1  ;;  %v486_v61 = vpop.f32.mrb[2].mxu0 }
 0x12e   :  { %v543_v62 = vmul.f32 1.442695, %v527_v59  ;;  %v487_v63 = vadd.f32 %v486_v61, %v343_v60  ;;  %v345_v1 = vpop.f32.mrb[3].mxu1  ;;  %v488_v2 = vpop.f32.mrb[3].mxu0 }
 0x12f   :  { %v545_v5 = vmul.f32 1.442695, %v528_v4  ;;  %v489_v6 = vadd.f32 %v488_v2, %v345_v1 }
 0x130   :  { %669 = vpow2.f32 %v543_v62  ;;  %v529_v7 = vadd.f32 -0.4, %v487_v63 }
 0x131   :  { %671 = vpow2.f32 %v545_v5  ;;  %v530_v8 = vadd.f32 -0.4, %v489_v6  ;;  %v349_v9 = vpop.f32.mrb[4].mxu1  ;;  %v492_v10 = vpop.f32.mrb[4].mxu0 }
 0x132   :  { %v547_v11 = vmul.f32 1.442695, %v529_v7  ;;  %v493_v12 = vadd.f32 %v492_v10, %v349_v9  ;;  %v351_v13 = vpop.f32.mrb[5].mxu1  ;;  %v494_v14 = vpop.f32.mrb[5].mxu0 }
 0x133   :  { %v549_v15 = vmul.f32 1.442695, %v530_v8  ;;  %v495_v16 = vadd.f32 %v494_v14, %v351_v13 }
 0x134   :  { %673 = vpow2.f32 %v547_v11  ;;  %v531_v17 = vadd.f32 -0.4, %v493_v12 }
 0x135   :  { %675 = vpow2.f32 %v549_v15  ;;  %v532_v18 = vadd.f32 -0.4, %v495_v16  ;;  %v355_v19 = vpop.f32.mrb[6].mxu1  ;;  %v498_v20 = vpop.f32.mrb[6].mxu0 }
 0x136   :  { %v551_v21 = vmul.f32 1.442695, %v531_v17  ;;  %v499_v22 = vadd.f32 %v498_v20, %v355_v19  ;;  %v357_v23 = vpop.f32.mrb[7].mxu1  ;;  %v500_v24 = vpop.f32.mrb[7].mxu0 }
 0x137   :  { %v553_v25 = vmul.f32 1.442695, %v532_v18  ;;  %v501_v26 = vadd.f32 %v500_v24, %v357_v23 }
 0x138   :  { %677 = vpow2.f32 %v551_v21  ;;  %v533_v27 = vadd.f32 -0.4, %v499_v22 }
 0x139   :  { %679 = vpow2.f32 %v553_v25  ;;  %v534_v28 = vadd.f32 -0.4, %v501_v26  ;;  %v361_v3 = vpop.f32.mrb[8].mxu1  ;;  %v504_v29 = vpop.f32.mrb[8].mxu0 }
 0x13a   :  { %v670_v30 = vpop.eup %669  ;;  %v555_v31 = vmul.f32 1.442695, %v533_v27  ;;  %v505_v32 = vadd.f32 %v504_v29, %v361_v3  ;;  %v363_v33 = vpop.f32.mrb[9].mxu1 }
 0x13b   :  { %v506_v34 = vpop.f32.mrb[9].mxu0  ;;  %v672_v35 = vpop.eup %671  ;;  %575 = vst [vmem:[#allocation2] sm:$0xff] %v670_v30  ;;  %v557_v36 = vmul.f32 1.442695, %v534_v28 }
 0x13c   :  { %v507_v37 = vadd.f32 %v506_v34, %v363_v33  ;;  %576 = vst [vmem:[#allocation2 + $0x8] sm:$0xff] %v672_v35  ;;  %681 = vpow2.f32 %v555_v31  ;;  %v535_v38 = vadd.f32 -0.4, %v505_v32 }
 0x13d   :  { %683 = vpow2.f32 %v557_v36  ;;  %v367_v39 = vpop.f32.mrb[10].mxu1  ;;  %v510_v40 = vpop.f32.mrb[10].mxu0 }
 0x13e   :  { %v536_v0 = vadd.f32 -0.4, %v507_v37  ;;  %v674_v41 = vpop.eup %673  ;;  %v559_v42 = vmul.f32 1.442695, %v535_v38  ;;  %v511_v43 = vadd.f32 %v510_v40, %v367_v39  ;;  %v369_v44 = vpop.f32.mrb[11].mxu1 }
 0x13f   :  { %v512_v45 = vpop.f32.mrb[11].mxu0  ;;  %v676_v46 = vpop.eup %675  ;;  %577 = vst [vmem:[#allocation2 + $0x10] sm:$0xff] %v674_v41 }
 0x140   :  { %v561_v47 = vmul.f32 1.442695, %v536_v0  ;;  %v513_v48 = vadd.f32 %v512_v45, %v369_v44  ;;  %578 = vst [vmem:[#allocation2 + $0x18] sm:$0xff] %v676_v46  ;;  %685 = vpow2.f32 %v559_v42  ;;  %v537_v49 = vadd.f32 -0.4, %v511_v43 }
 0x141   :  { %v373_v51 = vpop.f32.mrb[12].mxu1  ;;  %v516_v52 = vpop.f32.mrb[12].mxu0 }
 0x142   :  { %687 = vpow2.f32 %v561_v47  ;;  %v538_v50 = vadd.f32 -0.4, %v513_v48  ;;  %v678_v53 = vpop.eup %677  ;;  %v563_v54 = vmul.f32 1.442695, %v537_v49  ;;  %v517_v55 = vadd.f32 %v516_v52, %v373_v51  ;;  %v375_v56 = vpop.f32.mrb[13].mxu1 }
 0x143   :  { %v518_v57 = vpop.f32.mrb[13].mxu0  ;;  %v680_v58 = vpop.eup %679  ;;  %579 = vst [vmem:[#allocation2 + $0x20] sm:$0xff] %v678_v53 }
 0x144   :  { %v565_v59 = vmul.f32 1.442695, %v538_v50  ;;  %v519_v4 = vadd.f32 %v518_v57, %v375_v56  ;;  %580 = vst [vmem:[#allocation2 + $0x28] sm:$0xff] %v680_v58  ;;  %689 = vpow2.f32 %v563_v54  ;;  %v539_v60 = vadd.f32 -0.4, %v517_v55 }
 0x145   :  { %v379_v62 = vpop.f32.mrb[14].mxu1  ;;  %v522_v63 = vpop.f32.mrb[14].mxu0 }
 0x146   :  { %691 = vpow2.f32 %v565_v59  ;;  %v540_v61 = vadd.f32 -0.4, %v519_v4  ;;  %v682_v1 = vpop.eup %681  ;;  %v567_v2 = vmul.f32 1.442695, %v539_v60  ;;  %v523_v5 = vadd.f32 %v522_v63, %v379_v62  ;;  %v381_v6 = vpop.f32.mrb[15].mxu1 }
 0x147   :  { %v524_v7 = vpop.f32.mrb[15].mxu0  ;;  %v684_v8 = vpop.eup %683  ;;  %581 = vst [vmem:[#allocation2 + $0x30] sm:$0xff] %v682_v1 }
 0x148   :  { %v569_v9 = vmul.f32 1.442695, %v540_v61  ;;  %v525_v10 = vadd.f32 %v524_v7, %v381_v6  ;;  %582 = vst [vmem:[#allocation2 + $0x38] sm:$0xff] %v684_v8  ;;  %693 = vpow2.f32 %v567_v2  ;;  %v541_v11 = vadd.f32 -0.4, %v523_v5 }
 0x14a   :  { %695 = vpow2.f32 %v569_v9  ;;  %v542_v12 = vadd.f32 -0.4, %v525_v10  ;;  %v686_v13 = vpop.eup %685  ;;  %v571_v14 = vmul.f32 1.442695, %v541_v11 }
 0x14b   :  { %583 = vst [vmem:[#allocation2 + $0x40] sm:$0xff] %v686_v13 }
 0x14c   :  { %v688_v15 = vpop.eup %687  ;;  %v573_v16 = vmul.f32 1.442695, %v542_v12  ;;  %697 = vpow2.f32 %v571_v14 }
 0x14d   :  { %584 = vst [vmem:[#allocation2 + $0x48] sm:$0xff] %v688_v15 }
 0x14e   :  { %699 = vpow2.f32 %v573_v16  ;;  %v690_v17 = vpop.eup %689 }
 0x14f   :  { %585 = vst [vmem:[#allocation2 + $0x50] sm:$0xff] %v690_v17 }
 0x150   :  { %v692_v18 = vpop.eup %691 }
 0x151   :  { %586 = vst [vmem:[#allocation2 + $0x58] sm:$0xff] %v692_v18 }
 0x152   :  { %v694_v19 = vpop.eup %693 }
 0x153   :  { %587 = vst [vmem:[#allocation2 + $0x60] sm:$0xff] %v694_v19 }
 0x154   :  { %v696_v20 = vpop.eup %695 }
 0x155   :  { %588 = vst [vmem:[#allocation2 + $0x68] sm:$0xff] %v696_v20 }
 0x156   :  { %v698_v21 = vpop.eup %697 }
 0x157   :  { %589 = vst [vmem:[#allocation2 + $0x70] sm:$0xff] %v698_v21 }
 0x158   :  { %v700_v22 = vpop.eup %699 }
 0x159   :  { %590 = vst [vmem:[#allocation2 + $0x78] sm:$0xff] %v700_v22 }
 0x15a   :  { %712 = shalt.err (!%p709_p4)
}
 0x15b   :  { %s713_s20 = scalar_lea.hbm %s874_s3, 2048 }
 0x15c   :  { %p714_p5 = scmp.ne.s32.totalorder %s874_s3, %s713_s20  ;;  %p717_p6 = scmp.lt.u32.totalorder %s713_s20, %s874_s3 }
 0x15e   :  { %p719_p7 = pnand %p717_p6, %p714_p5 }
 0x160   :  { %722 = shalt.err (!%p719_p7)
}
 0x161   :  { %s733_s25 = smov 256   ;;  %s734_s26 = smov 16  }
 0x162   :  { %602 = dma.vmem_to_hbm [thread:$0]  %s597_s2, 2048, %s874_s3, [#allocation3], %s733_s25, %s733_s25, %s734_s26  }
 0x163   :  { %723 = dma.done.wait [#allocation3], 2048  }
 0x164   :  { %724 = vsyncadd [#allocation3], 4294965248 }
 0x165   :  { %606 = vsyncpa [#allocation3], 1 }

</bundles_post_ra>
